<compile_context>
chip_gen: v6e
topology: v6e:2x2x1
jax: 0.10.0
libtpu: 0.0.40
codegen_flags: <defaults>
</compile_context>

<pallas_src>
import jax
import jax.numpy as jnp
from jax import lax
from jax.experimental import pallas as pl
from jax.experimental.pallas import tpu as pltpu

K = 5          # kernel size
DILATION = 2   # dilation
PAD = DILATION * (K - 1)   # = 8; stride=1, padding=0 => H_out = H_in + PAD


def fused_convt_hs_dense_kernel(patches_ref, w2_ref, wd_ref, b_ref, o_ref):
    """ConvTranspose2d (as im2col matmul) + hard-sigmoid + Linear, fused.

    patches_ref: (N, Cin*K*K, P) f32, P = Hout*Wout   (im2col of zero-padded x)
    w2_ref:      (Cout, Cin*K*K) f32                  (flipped, channel-swapped weight)
    wd_ref:      (Dout, Cout*P)  f32                  (dense weight, PyTorch layout)
    b_ref:       (1, Dout)       f32
    o_ref:       (N, Dout)       f32
    """
    N = patches_ref.shape[0]
    Cout = w2_ref.shape[0]
    P = patches_ref.shape[2]

    # TODO(synk): if batch / spatial dims scale up, move this static loop to a
    # grid over N with dimension_semantics=("parallel",) so v7x's two
    # TensorCores split the work.
    for n in range(N):
        # conv-transpose for batch element n as one MXU matmul:
        #   (Cout, Cin*K*K) @ (Cin*K*K, P) -> (Cout, P), lane-dense (P = 256).
        conv = jnp.dot(w2_ref[...], patches_ref[n],
                       preferred_element_type=jnp.float32)
        # hard-sigmoid: clamp(v + 3, 0, 6) / 6
        hs = jnp.clip(conv + 3.0, 0.0, 6.0) * (1.0 / 6.0)

        # dense: y[n] = flatten(hs) @ Wd^T + b with NCHW flatten order
        # f = co*P + pq.  Contract each output-channel row of hs against the
        # matching lane-aligned P-wide column slab of Wd (Wd stays in its
        # native (Dout, F) layout; no transpose, no in-kernel relayout).
        acc = b_ref[...]                                            # (1, Dout)
        for co in range(Cout):
            acc = acc + lax.dot_general(
                hs[co:co + 1, :],                                   # (1, P)
                wd_ref[:, co * P:(co + 1) * P],                     # (Dout, P)
                dimension_numbers=(((1,), (1,)), ((), ())),
                preferred_element_type=jnp.float32)                 # (1, Dout)

        o_ref[pl.ds(n, 1), :] = acc.astype(o_ref.dtype)


def model_forward(x, w_convt, w_dense, b_dense):
    N, Cin, Hin, Win = x.shape
    Cout = w_convt.shape[1]
    Hout, Wout = Hin + PAD, Win + PAD
    P = Hout * Wout
    T = Cin * K * K

    # ---- tiny XLA-side glue: im2col so the conv becomes a single matmul ----
    # conv_transpose(stride=1, dilation=2) == dilated VALID conv of the
    # zero-padded input with the spatially flipped kernel, in/out chans swapped:
    #   y[n,co,p,q] = sum_{ci,a,b} x_pad[n,ci,p+D*a,q+D*b] * w[ci,co,K-1-a,K-1-b]
    xpad = jnp.pad(x, ((0, 0), (0, 0), (PAD, PAD), (PAD, PAD)))
    patches = jnp.stack(
        [xpad[:, :, DILATION * a:DILATION * a + Hout,
                    DILATION * b:DILATION * b + Wout]
         for a in range(K) for b in range(K)],
        axis=2)                                   # (N, Cin, K*K, Hout, Wout)
    patches = patches.reshape(N, T, P)            # t = ci*K*K + a*K + b

    # flipped / channel-swapped conv weight, flattened to (Cout, Cin*K*K) (~900 B)
    w2 = jnp.transpose(w_convt[:, :, ::-1, ::-1], (1, 0, 2, 3)).reshape(Cout, T)

    b2 = b_dense.reshape(1, -1)                   # (1, Dout)

    # everything (patches 150 KB + Wd 393 KB + out 1 KB) fits easily in VMEM
    return pl.pallas_call(
        fused_convt_hs_dense_kernel,
        out_shape=jax.ShapeDtypeStruct((N, w_dense.shape[0]), jnp.float32),
        in_specs=[pl.BlockSpec(memory_space=pltpu.MemorySpace.VMEM)] * 4,
        out_specs=pl.BlockSpec(memory_space=pltpu.MemorySpace.VMEM),
    )(patches, w2, w_dense, b2)


def _reference(x, w_convt, w_dense, b_dense):
    # pure-JAX reference: conv_transpose(stride=1) == dilated VALID conv on
    # padded input with flipped kernel and in/out channels swapped.
    wk = jnp.transpose(w_convt[:, :, ::-1, ::-1], (1, 0, 2, 3))  # (Cout, Cin, K, K)
    v1 = lax.conv_general_dilated(
        x, wk, window_strides=(1, 1),
        padding=[(PAD, PAD), (PAD, PAD)],
        rhs_dilation=(DILATION, DILATION),
        dimension_numbers=("NCHW", "OIHW", "NCHW"))
    v5 = jnp.clip(v1 + 3.0, 0.0, 6.0) / 6.0
    flat = v5.reshape(x.shape[0], -1)
    return flat @ w_dense.T + b_dense


if __name__ == "__main__":
    key = jax.random.PRNGKey(0)
    kx, kw, kd, kb = jax.random.split(key, 4)

    # small shapes: batch=2, channels fixed at 3 by the module, spatial 8x8
    N, Cin, Hin, Win = 2, 3, 8, 8
    Cout, Dout = 3, 128
    Hout, Wout = Hin + PAD, Win + PAD
    F = Cout * Hout * Wout  # 3*16*16 = 768 (module's 264 is inconsistent, see note)

    x = jax.random.normal(kx, (N, Cin, Hin, Win), jnp.float32)
    w_convt = jax.random.normal(kw, (Cin, Cout, K, K), jnp.float32) * 0.2
    w_dense = jax.random.normal(kd, (Dout, F), jnp.float32) * 0.05
    b_dense = jax.random.normal(kb, (Dout,), jnp.float32) * 0.01

    out = jax.jit(model_forward)(x, w_convt, w_dense, b_dense)
    jax.block_until_ready(out)

    ref = _reference(x, w_convt, w_dense, b_dense)
    assert out.shape == (N, Dout), out.shape
    assert jnp.allclose(out, ref, rtol=1e-3, atol=1e-3), (
        float(jnp.max(jnp.abs(out - ref))))

    print("KERNEL_OK")
</pallas_src>

<mosaic_0001>
module attributes {stable_mosaic.version = 11 : i64} {
  func.func @fused_convt_hs_dense_kernel(%arg0: memref<2x75x256xf32, #tpu.memory_space<vmem>>, %arg1: memref<3x75xf32, #tpu.memory_space<vmem>>, %arg2: memref<128x768xf32, #tpu.memory_space<vmem>>, %arg3: memref<1x128xf32, #tpu.memory_space<vmem>>, %arg4: memref<2x128xf32, #tpu.memory_space<vmem>>) attributes {dimension_semantics = [], scalar_prefetch = 0 : i64, scratch_operands = 0 : i64, tpu.core_type = #tpu.core_type<tc>} {
    %c0 = arith.constant 0 : index
    %c0_0 = arith.constant 0 : index
    %0 = vector.load %arg1[%c0, %c0_0] : memref<3x75xf32, #tpu.memory_space<vmem>>, vector<3x75xf32>
    %c0_1 = arith.constant 0 : index
    %c0_2 = arith.constant 0 : index
    %c0_3 = arith.constant 0 : index
    %1 = vector.load %arg0[%c0_1, %c0_2, %c0_3] : memref<2x75x256xf32, #tpu.memory_space<vmem>>, vector<1x75x256xf32>
    %2 = vector.shape_cast %1 : vector<1x75x256xf32> to vector<75x256xf32>
    %cst = arith.constant dense<0.000000e+00> : vector<3x256xf32>
    %3 = tpu.matmul %0, %2, %cst {dimension_numbers = #tpu.dot_dimension_numbers<[1], [0], [0], [1], [0, 0, 1, 1], [], []>} : vector<3x75xf32>, vector<75x256xf32>, vector<3x256xf32> -> vector<3x256xf32>
    %cst_4 = arith.constant 3.000000e+00 : f32
    %4 = vector.broadcast %cst_4 : f32 to vector<3x256xf32>
    %5 = arith.addf %3, %4 : vector<3x256xf32>
    %cst_5 = arith.constant 0.000000e+00 : f32
    %cst_6 = arith.constant 6.000000e+00 : f32
    %6 = vector.broadcast %cst_5 : f32 to vector<3x256xf32>
    %7 = arith.maximumf %6, %5 : vector<3x256xf32>
    %8 = vector.broadcast %cst_6 : f32 to vector<3x256xf32>
    %9 = arith.minimumf %8, %7 : vector<3x256xf32>
    %cst_7 = arith.constant 0.166666672 : f32
    %10 = vector.broadcast %cst_7 : f32 to vector<3x256xf32>
    %11 = arith.mulf %9, %10 : vector<3x256xf32>
    %c0_8 = arith.constant 0 : index
    %c0_9 = arith.constant 0 : index
    %12 = vector.load %arg3[%c0_8, %c0_9] : memref<1x128xf32, #tpu.memory_space<vmem>>, vector<1x128xf32>
    %13 = vector.extract_strided_slice %11 {offsets = [0, 0], sizes = [1, 256], strides = [1, 1]} : vector<3x256xf32> to vector<1x256xf32>
    %c0_10 = arith.constant 0 : index
    %c0_11 = arith.constant 0 : index
    %14 = vector.load %arg2[%c0_10, %c0_11] : memref<128x768xf32, #tpu.memory_space<vmem>>, vector<128x256xf32>
    %cst_12 = arith.constant dense<0.000000e+00> : vector<1x128xf32>
    %15 = tpu.matmul %13, %14, %cst_12 {dimension_numbers = #tpu.dot_dimension_numbers<[1], [1], [0], [0], [0, 0, 1, 0], [], []>} : vector<1x256xf32>, vector<128x256xf32>, vector<1x128xf32> -> vector<1x128xf32>
    %16 = arith.addf %12, %15 : vector<1x128xf32>
    %17 = vector.extract_strided_slice %11 {offsets = [1, 0], sizes = [1, 256], strides = [1, 1]} : vector<3x256xf32> to vector<1x256xf32>
    %c0_13 = arith.constant 0 : index
    %c256 = arith.constant 256 : index
    %18 = vector.load %arg2[%c0_13, %c256] : memref<128x768xf32, #tpu.memory_space<vmem>>, vector<128x256xf32>
    %cst_14 = arith.constant dense<0.000000e+00> : vector<1x128xf32>
    %19 = tpu.matmul %17, %18, %cst_14 {dimension_numbers = #tpu.dot_dimension_numbers<[1], [1], [0], [0], [0, 0, 1, 0], [], []>} : vector<1x256xf32>, vector<128x256xf32>, vector<1x128xf32> -> vector<1x128xf32>
    %20 = arith.addf %16, %19 : vector<1x128xf32>
    %21 = vector.extract_strided_slice %11 {offsets = [2, 0], sizes = [1, 256], strides = [1, 1]} : vector<3x256xf32> to vector<1x256xf32>
    %c0_15 = arith.constant 0 : index
    %c512 = arith.constant 512 : index
    %22 = vector.load %arg2[%c0_15, %c512] : memref<128x768xf32, #tpu.memory_space<vmem>>, vector<128x256xf32>
    %cst_16 = arith.constant dense<0.000000e+00> : vector<1x128xf32>
    %23 = tpu.matmul %21, %22, %cst_16 {dimension_numbers = #tpu.dot_dimension_numbers<[1], [1], [0], [0], [0, 0, 1, 0], [], []>} : vector<1x256xf32>, vector<128x256xf32>, vector<1x128xf32> -> vector<1x128xf32>
    %24 = arith.addf %20, %23 : vector<1x128xf32>
    %c0_17 = arith.constant 0 : index
    %c0_18 = arith.constant 0 : index
    %25 = vector.load %arg4[%c0_17, %c0_18] : memref<2x128xf32, #tpu.memory_space<vmem>>, vector<1x128xf32>
    tpu.vector_store %arg4[%c0_17, %c0_18], %24 {strides = array<i32>} : memref<2x128xf32, #tpu.memory_space<vmem>>, vector<1x128xf32>,
    %c0_19 = arith.constant 0 : index
    %c0_20 = arith.constant 0 : index
    %26 = vector.load %arg1[%c0_19, %c0_20] : memref<3x75xf32, #tpu.memory_space<vmem>>, vector<3x75xf32>
    %c1 = arith.constant 1 : index
    %c0_21 = arith.constant 0 : index
    %c0_22 = arith.constant 0 : index
    %27 = vector.load %arg0[%c1, %c0_21, %c0_22] : memref<2x75x256xf32, #tpu.memory_space<vmem>>, vector<1x75x256xf32>
    %28 = vector.shape_cast %27 : vector<1x75x256xf32> to vector<75x256xf32>
    %cst_23 = arith.constant dense<0.000000e+00> : vector<3x256xf32>
    %29 = tpu.matmul %26, %28, %cst_23 {dimension_numbers = #tpu.dot_dimension_numbers<[1], [0], [0], [1], [0, 0, 1, 1], [], []>} : vector<3x75xf32>, vector<75x256xf32>, vector<3x256xf32> -> vector<3x256xf32>
    %cst_24 = arith.constant 3.000000e+00 : f32
    %30 = vector.broadcast %cst_24 : f32 to vector<3x256xf32>
    %31 = arith.addf %29, %30 : vector<3x256xf32>
    %cst_25 = arith.constant 0.000000e+00 : f32
    %cst_26 = arith.constant 6.000000e+00 : f32
    %32 = vector.broadcast %cst_25 : f32 to vector<3x256xf32>
    %33 = arith.maximumf %32, %31 : vector<3x256xf32>
    %34 = vector.broadcast %cst_26 : f32 to vector<3x256xf32>
    %35 = arith.minimumf %34, %33 : vector<3x256xf32>
    %cst_27 = arith.constant 0.166666672 : f32
    %36 = vector.broadcast %cst_27 : f32 to vector<3x256xf32>
    %37 = arith.mulf %35, %36 : vector<3x256xf32>
    %c0_28 = arith.constant 0 : index
    %c0_29 = arith.constant 0 : index
    %38 = vector.load %arg3[%c0_28, %c0_29] : memref<1x128xf32, #tpu.memory_space<vmem>>, vector<1x128xf32>
    %39 = vector.extract_strided_slice %37 {offsets = [0, 0], sizes = [1, 256], strides = [1, 1]} : vector<3x256xf32> to vector<1x256xf32>
    %c0_30 = arith.constant 0 : index
    %c0_31 = arith.constant 0 : index
    %40 = vector.load %arg2[%c0_30, %c0_31] : memref<128x768xf32, #tpu.memory_space<vmem>>, vector<128x256xf32>
    %cst_32 = arith.constant dense<0.000000e+00> : vector<1x128xf32>
    %41 = tpu.matmul %39, %40, %cst_32 {dimension_numbers = #tpu.dot_dimension_numbers<[1], [1], [0], [0], [0, 0, 1, 0], [], []>} : vector<1x256xf32>, vector<128x256xf32>, vector<1x128xf32> -> vector<1x128xf32>
    %42 = arith.addf %38, %41 : vector<1x128xf32>
    %43 = vector.extract_strided_slice %37 {offsets = [1, 0], sizes = [1, 256], strides = [1, 1]} : vector<3x256xf32> to vector<1x256xf32>
    %c0_33 = arith.constant 0 : index
    %c256_34 = arith.constant 256 : index
    %44 = vector.load %arg2[%c0_33, %c256_34] : memref<128x768xf32, #tpu.memory_space<vmem>>, vector<128x256xf32>
    %cst_35 = arith.constant dense<0.000000e+00> : vector<1x128xf32>
    %45 = tpu.matmul %43, %44, %cst_35 {dimension_numbers = #tpu.dot_dimension_numbers<[1], [1], [0], [0], [0, 0, 1, 0], [], []>} : vector<1x256xf32>, vector<128x256xf32>, vector<1x128xf32> -> vector<1x128xf32>
    %46 = arith.addf %42, %45 : vector<1x128xf32>
    %47 = vector.extract_strided_slice %37 {offsets = [2, 0], sizes = [1, 256], strides = [1, 1]} : vector<3x256xf32> to vector<1x256xf32>
    %c0_36 = arith.constant 0 : index
    %c512_37 = arith.constant 512 : index
    %48 = vector.load %arg2[%c0_36, %c512_37] : memref<128x768xf32, #tpu.memory_space<vmem>>, vector<128x256xf32>
    %cst_38 = arith.constant dense<0.000000e+00> : vector<1x128xf32>
    %49 = tpu.matmul %47, %48, %cst_38 {dimension_numbers = #tpu.dot_dimension_numbers<[1], [1], [0], [0], [0, 0, 1, 0], [], []>} : vector<1x256xf32>, vector<128x256xf32>, vector<1x128xf32> -> vector<1x128xf32>
    %50 = arith.addf %46, %49 : vector<1x128xf32>
    %c1_39 = arith.constant 1 : index
    %c0_40 = arith.constant 0 : index
    %51 = vector.load %arg4[%c1_39, %c0_40] : memref<2x128xf32, #tpu.memory_space<vmem>>, vector<1x128xf32>
    tpu.vector_store %arg4[%c1_39, %c0_40], %50 {strides = array<i32>} : memref<2x128xf32, #tpu.memory_space<vmem>>, vector<1x128xf32>,
    return
  }
}

</mosaic_0001>

<bundles_post_ra>
// kernel: model_forward.1
= control target key start
LH: loop header
LB: loop body
LE: loop exit
PB: predicated region body
PF: predicated region fallthrough
CT: control target
= control target key end

     0   :  { %vm43_vm0 = vcmask 1042432   ;;  %v1793_v5 = vmov 0.0   ;;  %vm39_vm1 = vcmask 613376   ;;  %s1788_s0 = inlined_call_operand.vmem [shape: f32[2,75,256], index: 0, kind: input, shape index: {}]   ;;  %s1789_s1 = inlined_call_operand.vmem [shape: f32[3,75], index: 1, kind: input, shape index: {}]   ;;  %s1790_s2 = inlined_call_operand.vmem [shape: f32[128,768], index: 2, kind: input, shape index: {}]   ;;  %s1791_s3 = inlined_call_operand.vmem [shape: f32[1,128], index: 3, kind: input, shape index: {}]   ;;  %s1792_s4 = inlined_call_operand.hbm [shape: f32[2,128], index: 4, kind: output, shape index: {}]  }
   0x1   :  { %v38_v0 = vld [vmem:[%s1788_s0 + $0x98] sm:$0x7]  ;;  %v37_v1 = vld [vmem:[%s1788_s0 + $0x90] sm:$0x7]  ;;  %v36_v2 = vld [vmem:[%s1788_s0 + $0x88] sm:$0xff]  ;;  %114 = vmatprep.mubr.f32.mxu1 %v1793_v5 }
   0x2   :  { %891 = vmatprep.subr.msk.mxu1 %vm43_vm0, %v38_v0  ;;  %v35_v3 = vld [vmem:[%s1788_s0 + $0x80] sm:$0xff]  ;;  %v34_v4 = vld [vmem:[%s1788_s0 + $0x78] sm:$0xff]  ;;  %v33_v6 = vld [vmem:[%s1788_s0 + $0x70] sm:$0xff] }
   0x3   :  { %892 = vmatpush1.msk.msra.mxu1 %vm43_vm0, %v37_v1  ;;  %v32_v7 = vld [vmem:[%s1788_s0 + $0x68] sm:$0xff]  ;;  %v31_v8 = vld [vmem:[%s1788_s0 + $0x60] sm:$0xff]  ;;  %v30_v9 = vld [vmem:[%s1788_s0 + $0x58] sm:$0xff] }
   0x4   :  { %64 = vmatprep.subr.mxu1 %v36_v2  ;;  %v29_v10 = vld [vmem:[%s1788_s0 + $0x50] sm:$0xff]  ;;  %v1004_v11 = vld [vmem:[%s1790_s2 + $0x2e8] sm:$0xff]  ;;  %v1013_v13 = vld [vmem:[%s1790_s2 + $0x2e0] sm:$0xff] }
   0x5   :  { %65 = vmatpush1.msra.mxu1 %v35_v3  ;;  %v28_v12 = vld [vmem:[%s1788_s0 + $0x48] sm:$0xff]  ;;  %269 = vmatprep.subr.mxu0 %v1004_v11  ;;  %v27_v14 = vld [vmem:[%s1788_s0 + $0x40] sm:$0xff]  ;;  %v1022_v15 = vld [vmem:[%s1790_s2 + $0x2b8] sm:$0xff] }
   0x6   :  { %66 = vmatprep.subr.mxu1 %v34_v4  ;;  %270 = vmatpush1.xpose.msra.mxu0 %v1013_v13  ;;  %v26_v16 = vld [vmem:[%s1788_s0 + $0x38] sm:$0xff]  ;;  %v1031_v17 = vld [vmem:[%s1790_s2 + $0x2b0] sm:$0xff]  ;;  %v1039_v19 = vld [vmem:[%s1790_s2 + $0x288] sm:$0xff] }
   0x7   :  { %67 = vmatpush1.msra.mxu1 %v33_v6  ;;  %271 = vmatprep.subr.mxu0 %v1022_v15  ;;  %v25_v18 = vld [vmem:[%s1788_s0 + $0x30] sm:$0xff]  ;;  %v24_v20 = vld [vmem:[%s1788_s0 + $0x28] sm:$0xff]  ;;  %v23_v21 = vld [vmem:[%s1788_s0 + $0x20] sm:$0xff] }
   0x8   :  { %68 = vmatprep.subr.mxu1 %v32_v7  ;;  %v22_v22 = vld [vmem:[%s1788_s0 + $0x18] sm:$0xff]  ;;  %v1055_v23 = vld [vmem:[%s1790_s2 + $0x280] sm:$0xff]  ;;  %v21_v24 = vld [vmem:[%s1788_s0 + $0x10] sm:$0xff] }
   0x9   :  { %69 = vmatpush1.msra.mxu1 %v31_v8  ;;  %v1063_v25 = vld [vmem:[%s1790_s2 + $0x258] sm:$0xff]  ;;  %v20_v26 = vld [vmem:[%s1788_s0 + $0x8] sm:$0xff]  ;;  %v19_v27 = vld [vmem:[%s1788_s0] sm:$0xff] }
   0xa   :  { %70 = vmatprep.subr.mxu1 %v30_v9  ;;  %272 = vmatpush1.xpose.msra.mxu0 %v1031_v17  ;;  %v18_v28 = vld [vmem:[%s1789_s1] sm:$0x7]  ;;  %v1078_v29 = vld [vmem:[%s1790_s2 + $0x2d8] sm:$0xff]  ;;  %v1084_v30 = vld [vmem:[%s1790_s2 + $0x2d0] sm:$0xff] }
   0xb   :  { %71 = vmatpush1.msra.mxu1 %v29_v10  ;;  %273 = vmatprep.subr.mxu0 %v1039_v19  ;;  %v1089_v31 = vld [vmem:[%s1790_s2 + $0x250] sm:$0xff]  ;;  %v1094_v32 = vld [vmem:[%s1790_s2 + $0x2a8] sm:$0xff]  ;;  %v1109_v34 = vld [vmem:[%s1790_s2 + $0x2a0] sm:$0xff] }
   0xc   :  { %72 = vmatprep.subr.mxu1 %v28_v12  ;;  %v1099_v33 = vld [vmem:[%s1790_s2 + $0x228] sm:$0xff]  ;;  %v1115_v35 = vld [vmem:[%s1790_s2 + $0x220] sm:$0xff]  ;;  %v1120_v36 = vld [vmem:[%s1790_s2 + $0x278] sm:$0xff] }
   0xd   :  { %73 = vmatpush1.msra.mxu1 %v27_v14  ;;  %v1125_v37 = vld [vmem:[%s1790_s2 + $0x1f8] sm:$0xff] }
   0xe   :  { %74 = vmatprep.subr.mxu1 %v26_v16  ;;  %274 = vmatpush1.xpose.msra.mxu0 %v1055_v23 }
   0xf   :  { %75 = vmatpush1.msra.mxu1 %v25_v18  ;;  %275 = vmatprep.subr.mxu0 %v1063_v25 }
  0x10   :  { %76 = vmatprep.subr.mxu1 %v24_v20 }
  0x11   :  { %77 = vmatpush1.msra.mxu1 %v23_v21 }
  0x12   :  { %78 = vmatprep.subr.mxu1 %v22_v22  ;;  %276 = vmatpush1.xpose.msra.mxu0 %v1089_v31 }
  0x13   :  { %79 = vmatpush1.msra.mxu1 %v21_v24  ;;  %277 = vmatprep.subr.mxu0 %v1099_v33 }
  0x14   :  { %80 = vmatprep.subr.mxu1 %v20_v26 }
  0x15   :  { %81 = vmatpush1.msra.mxu1 %v19_v27 }
  0x16   :  { %893 = vmatmul.mubr.msk.f32.vlgmr.msra.gmra.mxu1 %vm39_vm1, %v18_v28  ;;  %160 = vmatprep.subr.mxu1 %v1078_v29 }
  0x17   :  { %161 = vmatpush1.xpose.msra.mxu1 %v1084_v30 }
  0x18   :  { %162 = vmatprep.subr.mxu1 %v1094_v32 }
  0x19   :  { %9 = vsyncpa [#allocation3], 0  ;;  %278 = vmatpush1.xpose.msra.mxu0 %v1115_v35  ;;  %v1133_v38 = vld [vmem:[%s1790_s2 + $0x270] sm:$0xff]  ;;  %v1144_v40 = vld [vmem:[%s1790_s2 + $0x248] sm:$0xff]  ;;  %s942_s30 = smov [#allocation2]  }
  0x1a   :  { %279 = vmatprep.subr.mxu0 %v1125_v37  ;;  %v1139_v39 = vld [vmem:[%s1790_s2 + $0x1f0] sm:$0xff]  ;;  %v1149_v41 = vld [vmem:[%s1790_s2 + $0x1c8] sm:$0xff]  ;;  %v1157_v42 = vld [vmem:[%s1790_s2 + $0x240] sm:$0xff]  ;;  %s883_s5 = sshll.u32 %s942_s30, 4  ;;  %s884_s5 = int_to_ptr.vmem [resolvable:$true] %s883_s5 }
  0x1b   :  { %163 = vmatpush1.xpose.msra.mxu1 %v1109_v34  ;;  %v1163_v43 = vld [vmem:[%s1790_s2 + $0x1c0] sm:$0xff]  ;;  %v1168_v44 = vld [vmem:[%s1790_s2 + $0x218] sm:$0xff]  ;;  %v1181_v46 = vld [vmem:[%s1790_s2 + $0x210] sm:$0xff]  ;;  %s919_s6 = scalar_lea.vmem %s884_s5, 32  ;;  %p924_p1 = scmp.lt.s32.totalorder %s884_s5, %s884_s5 }
  0x1c   :  { %164 = vmatprep.subr.mxu1 %v1120_v36  ;;  %v1173_v45 = vld [vmem:[%s1790_s2 + $0x198] sm:$0xff]  ;;  %v1187_v47 = vld [vmem:[%s1790_s2 + $0x190] sm:$0xff]  ;;  %v1192_v48 = vld [vmem:[%s1790_s2 + $0x1e8] sm:$0xff]  ;;  %p920_p0 = scmp.ne.s32.totalorder %s884_s5, %s919_s6  ;;  %p925_p2 = scmp.lt.s32.totalorder %s919_s6, %s919_s6 }
  0x1d   :  { %280 = vmatpush1.xpose.msra.mxu0 %v1139_v39  ;;  %v1197_v49 = vld [vmem:[%s1790_s2 + $0x168] sm:$0xff]  ;;  %v1205_v50 = vld [vmem:[%s1790_s2 + $0x1e0] sm:$0xff]  ;;  %v1216_v52 = vld [vmem:[%s1790_s2 + $0x1b8] sm:$0xff] }
  0x1e   :  { %281 = vmatprep.subr.mxu0 %v1149_v41  ;;  %v1211_v51 = vld [vmem:[%s1790_s2 + $0x160] sm:$0xff]  ;;  %v1221_v53 = vld [vmem:[%s1790_s2 + $0x138] sm:$0xff]  ;;  %v1229_v54 = vld [vmem:[%s1790_s2 + $0x1b0] sm:$0xff]  ;;  %p926_p3 = por %p925_p2, %p924_p1 }
  0x1f   :  { %165 = vmatpush1.xpose.msra.mxu1 %v1133_v38  ;;  %1813 = vst [vmem:[#allocation5_spill] sm:$0xff] %v1211_v51  ;;  %1814 = vst [vmem:[#allocation6_spill] sm:$0xff] %v1221_v53  ;;  %v1235_v55 = vld [vmem:[%s1790_s2 + $0x130] sm:$0xff]  ;;  %v1240_v56 = vld [vmem:[%s1790_s2 + $0x188] sm:$0xff] }
  0x20   :  { %166 = vmatprep.subr.mxu1 %v1144_v40  ;;  %1815 = vst [vmem:[#allocation7_spill] sm:$0xff] %v1235_v55  ;;  %v1245_v57 = vld [vmem:[%s1790_s2 + $0x108] sm:$0xff]  ;;  %v1253_v58 = vld [vmem:[%s1790_s2 + $0x180] sm:$0xff]  ;;  %v1264_v60 = vld [vmem:[%s1790_s2 + $0x158] sm:$0xff]  ;;  %p927_p4 = pnand %p926_p3, %p920_p0 }
  0x21   :  { %282 = vmatpush1.xpose.msra.mxu0 %v1163_v43  ;;  %1816 = vst [vmem:[#allocation8_spill] sm:$0xff] %v1245_v57  ;;  %v1259_v59 = vld [vmem:[%s1790_s2 + $0x100] sm:$0xff]  ;;  %v1269_v61 = vld [vmem:[%s1790_s2 + $0xd8] sm:$0xff]  ;;  %v1277_v62 = vld [vmem:[%s1790_s2 + $0x150] sm:$0xff] }
  0x22   :  { %283 = vmatprep.subr.mxu0 %v1173_v45  ;;  %1817 = vst [vmem:[#allocation9_spill] sm:$0xff] %v1259_v59  ;;  %1818 = vst [vmem:[#allocation10_spill] sm:$0xff] %v1269_v61  ;;  %v1283_v63 = vld [vmem:[%s1790_s2 + $0xd0] sm:$0xff]  ;;  %v1288_v0 = vld [vmem:[%s1790_s2 + $0x128] sm:$0xff] }
  0x23   :  { %167 = vmatpush1.xpose.msra.mxu1 %v1157_v42  ;;  %1819 = vst [vmem:[#allocation11_spill] sm:$0xff] %v1283_v63  ;;  %v1293_v1 = vld [vmem:[%s1790_s2 + $0xa8] sm:$0xff]  ;;  %v1301_v2 = vld [vmem:[%s1790_s2 + $0x120] sm:$0xff]  ;;  %v1312_v4 = vld [vmem:[%s1790_s2 + $0xf8] sm:$0xff] }
  0x24   :  { %168 = vmatprep.subr.mxu1 %v1168_v44  ;;  %1820 = vst [vmem:[#allocation12_spill] sm:$0xff] %v1293_v1  ;;  %v1307_v3 = vld [vmem:[%s1790_s2 + $0xa0] sm:$0xff]  ;;  %v1320_v6 = vld [vmem:[%s1790_s2 + $0xf0] sm:$0xff]  ;;  %v1325_v7 = vld [vmem:[%s1790_s2 + $0xc8] sm:$0xff] }
  0x25   :  { %284 = vmatpush1.xpose.msra.mxu0 %v1187_v47  ;;  %1821 = vst [vmem:[#allocation13_spill] sm:$0xff] %v1307_v3  ;;  %v1332_v8 = vld [vmem:[%s1790_s2 + $0xc0] sm:$0xff]  ;;  %v1337_v9 = vld [vmem:[%s1790_s2 + $0x98] sm:$0xff]  ;;  %v1344_v10 = vld [vmem:[%s1790_s2 + $0x90] sm:$0xff] }
  0x26   :  { %285 = vmatprep.subr.mxu0 %v1197_v49  ;;  %v1349_v12 = vld [vmem:[%s1790_s2 + $0x68] sm:$0xff]  ;;  %v1356_v14 = vld [vmem:[%s1790_s2 + $0x60] sm:$0xff]  ;;  %v1362_v16 = vld [vmem:[%s1790_s2 + $0x78] sm:$0xff] }
  0x27   :  { %169 = vmatpush1.xpose.msra.mxu1 %v1181_v46  ;;  %1822 = vst [vmem:[#allocation14_spill] sm:$0xff] %v1362_v16  ;;  %v1368_v18 = vld [vmem:[%s1790_s2 + $0x70] sm:$0xff]  ;;  %v1374_v20 = vld [vmem:[%s1790_s2 + $0x38] sm:$0xff]  ;;  %v1386_v22 = vld [vmem:[%s1790_s2 + $0x48] sm:$0xff] }
  0x28   :  { %170 = vmatprep.subr.mxu1 %v1192_v48  ;;  %1823 = vst [vmem:[#allocation15_spill] sm:$0xff] %v1368_v18  ;;  %v1380_v21 = vld [vmem:[%s1790_s2 + $0x30] sm:$0xff]  ;;  %1824 = vst [vmem:[#allocation16_spill] sm:$0xff] %v1386_v22  ;;  %v1392_v24 = vld [vmem:[%s1790_s2 + $0x40] sm:$0xff] }
  0x29   :  { %286 = vmatpush1.xpose.msra.mxu0 %v1211_v51  ;;  %1825 = vst [vmem:[#allocation17_spill] sm:$0xff] %v1392_v24  ;;  %v1398_v26 = vld [vmem:[%s1790_s2 + $0x8] sm:$0xff]  ;;  %v1404_v27 = vld [vmem:[%s1790_s2] sm:$0xff]  ;;  %v1410_v28 = vld [vmem:[%s1790_s2 + $0x18] sm:$0xff] }
  0x2a   :  { %287 = vmatprep.subr.mxu0 %v1221_v53  ;;  %1826 = vst [vmem:[#allocation18_spill] sm:$0xff] %v1410_v28  ;;  %v1416_v5 = vld [vmem:[%s1790_s2 + $0x10] sm:$0xff] }
  0x2b   :  { %171 = vmatpush1.xpose.msra.mxu1 %v1205_v50  ;;  %1827 = vst [vmem:[#allocation19_spill] sm:$0xff] %v1416_v5 }
  0x2c   :  { %172 = vmatprep.subr.mxu1 %v1216_v52 }
  0x2d   :  { %288 = vmatpush1.xpose.msra.mxu0 %v1235_v55  ;;  %v1434_v55 = vld [vmem:[%s1790_s2 + $0x2f0] sm:$0xff] }
  0x2e   :  { %289 = vmatprep.subr.mxu0 %v1245_v57 }
  0x2f   :  { %173 = vmatpush1.xpose.msra.mxu1 %v1229_v54 }
  0x30   :  { %174 = vmatprep.subr.mxu1 %v1240_v56 }
  0x31   :  { %290 = vmatpush1.xpose.msra.mxu0 %v1259_v59 }
  0x32   :  { %291 = vmatprep.subr.mxu0 %v1269_v61 }
  0x33   :  { %175 = vmatpush1.xpose.msra.mxu1 %v1253_v58 }
  0x34   :  { %176 = vmatprep.subr.mxu1 %v1264_v60 }
  0x35   :  { %292 = vmatpush1.xpose.msra.mxu0 %v1283_v63 }
  0x36   :  { %293 = vmatprep.subr.mxu0 %v1293_v1 }
  0x37   :  { %177 = vmatpush1.xpose.msra.mxu1 %v1277_v62 }
  0x38   :  { %178 = vmatprep.subr.mxu1 %v1288_v0 }
  0x39   :  { %294 = vmatpush1.xpose.msra.mxu0 %v1307_v3 }
  0x3a   :  { %295 = vmatprep.subr.mxu0 %v1362_v16 }
  0x3b   :  { %179 = vmatpush1.xpose.msra.mxu1 %v1301_v2 }
  0x3c   :  { %180 = vmatprep.subr.mxu1 %v1312_v4 }
  0x3d   :  { %296 = vmatpush1.xpose.msra.mxu0 %v1368_v18 }
  0x3e   :  { %297 = vmatprep.subr.mxu0 %v1386_v22  ;;  %v913_v22 = vld [vmem:[%s1788_s0 + $0x138] sm:$0x7] }
  0x3f   :  { %181 = vmatpush1.xpose.msra.mxu1 %v1320_v6 }
  0x40   :  { %182 = vmatprep.subr.mxu1 %v1325_v7 }
  0x41   :  { %298 = vmatpush1.xpose.msra.mxu0 %v1392_v24  ;;  %v1422_v24 = vld [vmem:[%s1790_s2 + $0x2f8] sm:$0xff] }
  0x42   :  { %299 = vmatprep.subr.mxu0 %v1410_v28 }
  0x43   :  { %183 = vmatpush1.xpose.msra.mxu1 %v1332_v8 }
  0x44   :  { %184 = vmatprep.subr.mxu1 %v1337_v9 }
  0x45   :  { %300 = vmatpush1.xpose.msra.mxu0 %v1416_v5 }
  0x46   :  { %914 = vmatprep.subr.msk.mxu0 %vm43_vm0, %v913_v22 }
  0x47   :  { %185 = vmatpush1.xpose.msra.mxu1 %v1344_v10 }
  0x48   :  { %186 = vmatprep.subr.mxu1 %v1349_v12 }
  0x4b   :  { %187 = vmatpush1.xpose.msra.mxu1 %v1356_v14 }
  0x4c   :  { %188 = vmatprep.subr.mxu1 %v1374_v20 }
  0x4f   :  { %189 = vmatpush1.xpose.msra.mxu1 %v1380_v21 }
  0x50   :  { %190 = vmatprep.subr.mxu1 %v1398_v26 }
  0x53   :  { %191 = vmatpush1.xpose.msra.mxu1 %v1404_v27 }
  0x54   :  { %376 = vmatprep.subr.mxu1 %v1422_v24 }
  0xd6   :  { %v116_v28 = vpop.f32.mrf.mxu1 }
  0xd7   :  { %v117_v18 = vadd.f32 3.0, %v116_v28  ;;  %v1480_v28 = vld [vmem:[%s1790_s2 + $0x290] sm:$0xff] }
  0xd8   :  { %v118_v16 = vpop.f32.mrf.mxu1 }
  0xd9   :  { %v121_v3 = vmax.f32 %v117_v18, 0.0  ;;  %v119_v1 = vadd.f32 3.0, %v118_v16  ;;  %v1828_v16 = vmov 0.0   ;;  %v907_v18 = vld [vmem:[%s1788_s0 + $0x108] sm:$0xff] }
  0xdb   :  { %v123_v63 = vmin.f32 %v121_v3, 6.0  ;;  %v122_v5 = vmax.f32 %v119_v1, 0.0  ;;  %v912_v1 = vld [vmem:[%s1788_s0 + $0x130] sm:$0x7] }
  0xdc   :  { %v908_v3 = vld [vmem:[%s1788_s0 + $0x110] sm:$0xff] }
  0xdd   :  { %v124_v61 = vmin.f32 %v122_v5, 6.0  ;;  %v1429_v59 = vmul.f32 0.16666667, %v123_v63  ;;  %v1444_v5 = vld [vmem:[%s1790_s2 + $0x2c8] sm:$0xff]  ;;  %v910_v63 = vld [vmem:[%s1788_s0 + $0x120] sm:$0xff] }
  0xdf   :  { %v126_v57 = vmul.f32 0.16666667, %v124_v61  ;;  %v265_v22 = vrot.slane %v1429_v59, 1  ;;  %v1453_v61 = vld [vmem:[%s1790_s2 + $0x2c0] sm:$0xff] }
  0xe1   :  { %224 = vmatprep.mubr.f32.mxu1 %v126_v57  ;;  %v266_v53 = vrot.slane %v126_v57, 1  ;;  %v373_v51 = vrot.slane %v126_v57, 2  ;;  %v911_v57 = vld [vmem:[%s1788_s0 + $0x128] sm:$0xff] }
  0xe2   :  { %225 = vmatmul.mubr.f32.vlgmr.msra.gmra.mxu1 %v1429_v59 }
  0xe3   :  { %377 = vmatpush1.xpose.msra.mxu1 %v1434_v55  ;;  %333 = vmatprep.mubr.f32.mxu0 %v266_v53  ;;  %v909_v53 = vld [vmem:[%s1788_s0 + $0x118] sm:$0xff] }
  0xe4   :  { %440 = vmatprep.mubr.f32.mxu1 %v373_v51  ;;  %334 = vmatmul.mubr.f32.vlgmr.msra.gmra.mxu0 %v265_v22  ;;  %v1466_v51 = vld [vmem:[%s1790_s2 + $0x298] sm:$0xff]  ;;  %v906_v22 = vld [vmem:[%s1788_s0 + $0x100] sm:$0xff] }
  0xe5   :  { %915 = vmatpush1.msk.msra.mxu0 %vm43_vm0, %v912_v1  ;;  %378 = vmatprep.subr.mxu1 %v1444_v5  ;;  %v905_v1 = vld [vmem:[%s1788_s0 + $0xf8] sm:$0xff] }
  0xe6   :  { %493 = vmatprep.subr.mxu0 %v911_v57  ;;  %543 = vmatprep.mubr.f32.mxu0 %v1828_v16  ;;  %v1491_v57 = vld [vmem:[%s1790_s2 + $0x268] sm:$0xff]  ;;  %v902_v16 = vld [vmem:[%s1788_s0 + $0xe0] sm:$0xff] }
  0xe7   :  { %379 = vmatpush1.xpose.msra.mxu1 %v1453_v61  ;;  %494 = vmatpush1.msra.mxu0 %v910_v63  ;;  %1829 = vst [vmem:[#allocation20_spill] sm:$0xff] %v1491_v57  ;;  %v904_v63 = vld [vmem:[%s1788_s0 + $0xf0] sm:$0xff] }
  0xe8   :  { %495 = vmatprep.subr.mxu0 %v909_v53  ;;  %380 = vmatprep.subr.mxu1 %v1466_v51  ;;  %v903_v53 = vld [vmem:[%s1788_s0 + $0xe8] sm:$0xff] }
  0xe9   :  { %496 = vmatpush1.msra.mxu0 %v908_v3  ;;  %v1504_v3 = vld [vmem:[%s1790_s2 + $0x260] sm:$0xff] }
  0xea   :  { %497 = vmatprep.subr.mxu0 %v907_v18  ;;  %1830 = vst [vmem:[#allocation21_spill] sm:$0xff] %v1504_v3  ;;  %v901_v18 = vld [vmem:[%s1788_s0 + $0xd8] sm:$0xff] }
  0xeb   :  { %381 = vmatpush1.xpose.msra.mxu1 %v1480_v28  ;;  %498 = vmatpush1.msra.mxu0 %v906_v22  ;;  %v1515_v22 = vld [vmem:[%s1790_s2 + $0x238] sm:$0xff] }
  0xec   :  { %499 = vmatprep.subr.mxu0 %v905_v1  ;;  %382 = vmatprep.subr.mxu1 %v1491_v57  ;;  %1831 = vst [vmem:[#allocation22_spill] sm:$0xff] %v1515_v22  ;;  %v900_v1 = vld [vmem:[%s1788_s0 + $0xd0] sm:$0xff] }
  0xed   :  { %500 = vmatpush1.msra.mxu0 %v904_v63  ;;  %v899_v63 = vld [vmem:[%s1788_s0 + $0xc8] sm:$0xff]  ;;  %v1528_v57 = vld [vmem:[%s1790_s2 + $0x230] sm:$0xff] }
  0xee   :  { %501 = vmatprep.subr.mxu0 %v903_v53  ;;  %v898_v53 = vld [vmem:[%s1788_s0 + $0xc0] sm:$0xff] }
  0xef   :  { %383 = vmatpush1.xpose.msra.mxu1 %v1504_v3  ;;  %502 = vmatpush1.msra.mxu0 %v902_v16  ;;  %v897_v16 = vld [vmem:[%s1788_s0 + $0xb8] sm:$0xff]  ;;  %v1552_v3 = vld [vmem:[%s1790_s2 + $0x200] sm:$0xff] }
  0xf0   :  { %503 = vmatprep.subr.mxu0 %v901_v18  ;;  %384 = vmatprep.subr.mxu1 %v1515_v22  ;;  %v1539_v18 = vld [vmem:[%s1790_s2 + $0x208] sm:$0xff]  ;;  %v896_v22 = vld [vmem:[%s1788_s0 + $0xb0] sm:$0xff] }
  0xf1   :  { %504 = vmatpush1.msra.mxu0 %v900_v1  ;;  %1832 = vst [vmem:[#allocation23_spill] sm:$0xff] %v1539_v18  ;;  %v895_v1 = vld [vmem:[%s1788_s0 + $0xa8] sm:$0xff] }
  0xf2   :  { %505 = vmatprep.subr.mxu0 %v899_v63  ;;  %v894_v63 = vld [vmem:[%s1788_s0 + $0xa0] sm:$0xff] }
  0xf3   :  { %385 = vmatpush1.xpose.msra.mxu1 %v1528_v57  ;;  %506 = vmatpush1.msra.mxu0 %v898_v53  ;;  %v448_v53 = vld [vmem:[%s1789_s1] sm:$0x7] }
  0xf4   :  { %507 = vmatprep.subr.mxu0 %v897_v16  ;;  %386 = vmatprep.subr.mxu1 %v1539_v18  ;;  %v1563_v16 = vld [vmem:[%s1790_s2 + $0x1d8] sm:$0xff]  ;;  %v1576_v18 = vld [vmem:[%s1790_s2 + $0x1a8] sm:$0xff] }
  0xf5   :  { %508 = vmatpush1.msra.mxu0 %v896_v22  ;;  %v1571_v22 = vld [vmem:[%s1790_s2 + $0x1d0] sm:$0xff] }
  0xf6   :  { %509 = vmatprep.subr.mxu0 %v895_v1  ;;  %v1586_v1 = vld [vmem:[%s1790_s2 + $0x1a0] sm:$0xff] }
  0xf7   :  { %387 = vmatpush1.xpose.msra.mxu1 %v1552_v3  ;;  %510 = vmatpush1.msra.mxu0 %v894_v63  ;;  %v1591_v63 = vld [vmem:[%s1790_s2 + $0x178] sm:$0xff] }
  0xf8   :  { %916 = vmatmul.mubr.msk.f32.vlgmr.msra.gmra.mxu0 %vm39_vm1, %v448_v53  ;;  %388 = vmatprep.subr.mxu1 %v1563_v16 }
  0xf9   :  { %589 = vmatprep.subr.mxu0 %v1078_v29  ;;  %v1600_v29 = vld [vmem:[%s1790_s2 + $0x170] sm:$0xff] }
  0xfa   :  { %590 = vmatpush1.xpose.msra.mxu0 %v1084_v30  ;;  %v1605_v30 = vld [vmem:[%s1790_s2 + $0x148] sm:$0xff] }
  0xfb   :  { %389 = vmatpush1.xpose.msra.mxu1 %v1571_v22  ;;  %591 = vmatprep.subr.mxu0 %v1094_v32  ;;  %v1614_v32 = vld [vmem:[%s1790_s2 + $0x140] sm:$0xff] }
  0xfc   :  { %390 = vmatprep.subr.mxu1 %v1576_v18 }
  0xfe   :  { %592 = vmatpush1.xpose.msra.mxu0 %v1109_v34  ;;  %v1619_v34 = vld [vmem:[%s1790_s2 + $0x118] sm:$0xff] }
  0xff   :  { %391 = vmatpush1.xpose.msra.mxu1 %v1586_v1  ;;  %593 = vmatprep.subr.mxu0 %v1120_v36  ;;  %v1628_v36 = vld [vmem:[%s1790_s2 + $0x110] sm:$0xff] }
 0x100   :  { %392 = vmatprep.subr.mxu1 %v1591_v63 }
 0x102   :  { %594 = vmatpush1.xpose.msra.mxu0 %v1133_v38  ;;  %v1633_v38 = vld [vmem:[%s1790_s2 + $0xe8] sm:$0xff] }
 0x103   :  { %393 = vmatpush1.xpose.msra.mxu1 %v1600_v29  ;;  %595 = vmatprep.subr.mxu0 %v1144_v40  ;;  %v1642_v40 = vld [vmem:[%s1790_s2 + $0xe0] sm:$0xff] }
 0x104   :  { %394 = vmatprep.subr.mxu1 %v1605_v30 }
 0x106   :  { %596 = vmatpush1.xpose.msra.mxu0 %v1157_v42  ;;  %v1647_v42 = vld [vmem:[%s1790_s2 + $0xb8] sm:$0xff] }
 0x107   :  { %395 = vmatpush1.xpose.msra.mxu1 %v1614_v32  ;;  %597 = vmatprep.subr.mxu0 %v1168_v44  ;;  %v1656_v44 = vld [vmem:[%s1790_s2 + $0xb0] sm:$0xff] }
 0x108   :  { %396 = vmatprep.subr.mxu1 %v1619_v34 }
 0x10a   :  { %598 = vmatpush1.xpose.msra.mxu0 %v1181_v46  ;;  %v1661_v46 = vld [vmem:[%s1790_s2 + $0x88] sm:$0xff] }
 0x10b   :  { %397 = vmatpush1.xpose.msra.mxu1 %v1628_v36  ;;  %599 = vmatprep.subr.mxu0 %v1192_v48  ;;  %v1670_v48 = vld [vmem:[%s1790_s2 + $0x80] sm:$0xff] }
 0x10c   :  { %398 = vmatprep.subr.mxu1 %v1633_v38 }
 0x10e   :  { %600 = vmatpush1.xpose.msra.mxu0 %v1205_v50  ;;  %v1675_v50 = vld [vmem:[%s1790_s2 + $0x58] sm:$0xff] }
 0x10f   :  { %399 = vmatpush1.xpose.msra.mxu1 %v1642_v40  ;;  %601 = vmatprep.subr.mxu0 %v1216_v52  ;;  %v1684_v52 = vld [vmem:[%s1790_s2 + $0x50] sm:$0xff] }
 0x110   :  { %400 = vmatprep.subr.mxu1 %v1647_v42 }
 0x112   :  { %602 = vmatpush1.xpose.msra.mxu0 %v1229_v54  ;;  %v1689_v54 = vld [vmem:[%s1790_s2 + $0x28] sm:$0xff] }
 0x113   :  { %401 = vmatpush1.xpose.msra.mxu1 %v1656_v44  ;;  %603 = vmatprep.subr.mxu0 %v1240_v56  ;;  %v1698_v56 = vld [vmem:[%s1790_s2 + $0x20] sm:$0xff] }
 0x114   :  { %402 = vmatprep.subr.mxu1 %v1661_v46 }
 0x116   :  { %604 = vmatpush1.xpose.msra.mxu0 %v1253_v58  ;;  %v372_v58 = vrot.slane %v1429_v59, 2 }
 0x117   :  { %403 = vmatpush1.xpose.msra.mxu1 %v1670_v48  ;;  %605 = vmatprep.subr.mxu0 %v1264_v60 }
 0x118   :  { %404 = vmatprep.subr.mxu1 %v1675_v50 }
 0x11a   :  { %606 = vmatpush1.xpose.msra.mxu0 %v1277_v62 }
 0x11b   :  { %405 = vmatpush1.xpose.msra.mxu1 %v1684_v52  ;;  %607 = vmatprep.subr.mxu0 %v1288_v0 }
 0x11c   :  { %406 = vmatprep.subr.mxu1 %v1689_v54 }
 0x11e   :  { %608 = vmatpush1.xpose.msra.mxu0 %v1301_v2 }
 0x11f   :  { %407 = vmatpush1.xpose.msra.mxu1 %v1698_v56  ;;  %609 = vmatprep.subr.mxu0 %v1312_v4 }
 0x120   :  { %698 = vmatprep.subr.mxu1 %v1004_v11  ;;  %v1833_v11 = vld [vmem:[#allocation5_spill] sm:$0xff] }
 0x122   :  { %441 = vmatmul.mubr.f32.vlgmr.msra.gmra.mxu1 %v372_v58  ;;  %610 = vmatpush1.xpose.msra.mxu0 %v1320_v6 }
 0x123   :  { %699 = vmatpush1.xpose.msra.mxu1 %v1013_v13  ;;  %611 = vmatprep.subr.mxu0 %v1325_v7  ;;  %v1834_v13 = vld [vmem:[#allocation6_spill] sm:$0xff] }
 0x124   :  { %700 = vmatprep.subr.mxu1 %v1022_v15  ;;  %v1835_v15 = vld [vmem:[#allocation7_spill] sm:$0xff] }
 0x126   :  { %612 = vmatpush1.xpose.msra.mxu0 %v1332_v8 }
 0x127   :  { %701 = vmatpush1.xpose.msra.mxu1 %v1031_v17  ;;  %613 = vmatprep.subr.mxu0 %v1337_v9  ;;  %v1836_v17 = vld [vmem:[#allocation8_spill] sm:$0xff] }
 0x128   :  { %702 = vmatprep.subr.mxu1 %v1039_v19  ;;  %v1837_v19 = vld [vmem:[#allocation9_spill] sm:$0xff] }
 0x12a   :  { %614 = vmatpush1.xpose.msra.mxu0 %v1344_v10 }
 0x12b   :  { %703 = vmatpush1.xpose.msra.mxu1 %v1055_v23  ;;  %615 = vmatprep.subr.mxu0 %v1349_v12  ;;  %v1838_v23 = vld [vmem:[#allocation10_spill] sm:$0xff] }
 0x12c   :  { %704 = vmatprep.subr.mxu1 %v1063_v25  ;;  %v1839_v25 = vld [vmem:[#allocation11_spill] sm:$0xff] }
 0x12e   :  { %616 = vmatpush1.xpose.msra.mxu0 %v1356_v14 }
 0x12f   :  { %705 = vmatpush1.xpose.msra.mxu1 %v1089_v31  ;;  %617 = vmatprep.subr.mxu0 %v1374_v20  ;;  %v1840_v31 = vld [vmem:[#allocation12_spill] sm:$0xff] }
 0x130   :  { %706 = vmatprep.subr.mxu1 %v1099_v33  ;;  %v1841_v33 = vld [vmem:[#allocation13_spill] sm:$0xff] }
 0x132   :  { %618 = vmatpush1.xpose.msra.mxu0 %v1380_v21 }
 0x133   :  { %707 = vmatpush1.xpose.msra.mxu1 %v1115_v35  ;;  %619 = vmatprep.subr.mxu0 %v1398_v26  ;;  %v1842_v35 = vld [vmem:[#allocation14_spill] sm:$0xff]  ;;  %v1849_v26 = vld [vmem:[#allocation21_spill] sm:$0xff] }
 0x134   :  { %708 = vmatprep.subr.mxu1 %v1125_v37  ;;  %v1843_v37 = vld [vmem:[#allocation15_spill] sm:$0xff] }
 0x136   :  { %620 = vmatpush1.xpose.msra.mxu0 %v1404_v27  ;;  %v1850_v27 = vld [vmem:[#allocation22_spill] sm:$0xff] }
 0x137   :  { %709 = vmatpush1.xpose.msra.mxu1 %v1139_v39  ;;  %805 = vmatprep.subr.mxu0 %v1422_v24  ;;  %v1844_v39 = vld [vmem:[#allocation16_spill] sm:$0xff] }
 0x138   :  { %710 = vmatprep.subr.mxu1 %v1149_v41  ;;  %v1845_v41 = vld [vmem:[#allocation17_spill] sm:$0xff]  ;;  %v1848_v24 = vld [vmem:[#allocation20_spill] sm:$0xff] }
 0x13b   :  { %711 = vmatpush1.xpose.msra.mxu1 %v1163_v43  ;;  %v1846_v43 = vld [vmem:[#allocation18_spill] sm:$0xff] }
 0x13c   :  { %712 = vmatprep.subr.mxu1 %v1173_v45  ;;  %v1847_v45 = vld [vmem:[#allocation19_spill] sm:$0xff] }
 0x13f   :  { %713 = vmatpush1.xpose.msra.mxu1 %v1187_v47 }
 0x140   :  { %714 = vmatprep.subr.mxu1 %v1197_v49 }
 0x143   :  { %715 = vmatpush1.xpose.msra.mxu1 %v1833_v11 }
 0x144   :  { %716 = vmatprep.subr.mxu1 %v1834_v13 }
 0x147   :  { %717 = vmatpush1.xpose.msra.mxu1 %v1835_v15 }
 0x148   :  { %718 = vmatprep.subr.mxu1 %v1836_v17 }
 0x14b   :  { %719 = vmatpush1.xpose.msra.mxu1 %v1837_v19 }
 0x14c   :  { %720 = vmatprep.subr.mxu1 %v1838_v23 }
 0x14f   :  { %721 = vmatpush1.xpose.msra.mxu1 %v1839_v25 }
 0x150   :  { %722 = vmatprep.subr.mxu1 %v1840_v31 }
 0x153   :  { %723 = vmatpush1.xpose.msra.mxu1 %v1841_v33 }
 0x154   :  { %724 = vmatprep.subr.mxu1 %v1842_v35 }
 0x157   :  { %725 = vmatpush1.xpose.msra.mxu1 %v1843_v37 }
 0x158   :  { %726 = vmatprep.subr.mxu1 %v1844_v39 }
 0x15b   :  { %727 = vmatpush1.xpose.msra.mxu1 %v1845_v41 }
 0x15c   :  { %728 = vmatprep.subr.mxu1 %v1846_v43 }
 0x15f   :  { %729 = vmatpush1.xpose.msra.mxu1 %v1847_v45 }
 0x1a2   :  { %v226_v47 = vpop.f32.mrf.mxu1 }
 0x1a4   :  { %v228_v49 = vpop.f32.mrf.mxu1  ;;  %v335_v59 = vpop.f32.mrf.mxu0 }
 0x1a6   :  { %v337_v60 = vpop.f32.mrf.mxu0 }
 0x1b8   :  { %v545_v62 = vpop.f32.mrf.mxu0 }
 0x1b9   :  { %v546_v0 = vadd.f32 3.0, %v545_v62 }
 0x1ba   :  { %v547_v2 = vpop.f32.mrf.mxu0 }
 0x1bb   :  { %v550_v4 = vmax.f32 %v546_v0, 0.0  ;;  %v548_v6 = vadd.f32 3.0, %v547_v2 }
 0x1bd   :  { %v552_v7 = vmin.f32 %v550_v4, 6.0  ;;  %v551_v8 = vmax.f32 %v548_v6, 0.0 }
 0x1bf   :  { %v553_v9 = vmin.f32 %v551_v8, 6.0  ;;  %v554_v10 = vmul.f32 0.16666667, %v552_v7 }
 0x1c1   :  { %v555_v12 = vmul.f32 0.16666667, %v553_v9  ;;  %v694_v21 = vrot.slane %v554_v10, 1 }
 0x1c3   :  { %653 = vmatprep.mubr.f32.mxu0 %v555_v12  ;;  %v695_v14 = vrot.slane %v555_v12, 1  ;;  %v802_v20 = vrot.slane %v555_v12, 2 }
 0x1c4   :  { %654 = vmatmul.mubr.f32.vlgmr.msra.gmra.mxu0 %v554_v10 }
 0x1c5   :  { %806 = vmatpush1.xpose.msra.mxu0 %v1434_v55  ;;  %762 = vmatprep.mubr.f32.mxu1 %v695_v14  ;;  %v1851_v55 = vld [vmem:[#allocation23_spill] sm:$0xff] }
 0x1c6   :  { %869 = vmatprep.mubr.f32.mxu0 %v802_v20  ;;  %763 = vmatmul.mubr.f32.vlgmr.msra.gmra.mxu1 %v694_v21 }
 0x1c7   :  { %807 = vmatprep.subr.mxu0 %v1444_v5  ;;  %v127_v5 = vld [vmem:[%s1791_s3] sm:$0x1] }
 0x1c9   :  { %808 = vmatpush1.xpose.msra.mxu0 %v1453_v61  ;;  %v230_v61 = vadd.f32 %v226_v47, %v127_v5 }
 0x1ca   :  { %809 = vmatprep.subr.mxu0 %v1466_v51 }
 0x1cb   :  { %v339_v51 = vadd.f32 %v335_v59, %v230_v61 }
 0x1cd   :  { %810 = vmatpush1.xpose.msra.mxu0 %v1480_v28 }
 0x1ce   :  { %811 = vmatprep.subr.mxu0 %v1848_v24 }
 0x1d1   :  { %812 = vmatpush1.xpose.msra.mxu0 %v1849_v26 }
 0x1d2   :  { %813 = vmatprep.subr.mxu0 %v1850_v27 }
 0x1d5   :  { %814 = vmatpush1.xpose.msra.mxu0 %v1528_v57 }
 0x1d6   :  { %815 = vmatprep.subr.mxu0 %v1851_v55 }
 0x1d9   :  { %816 = vmatpush1.xpose.msra.mxu0 %v1552_v3  ;;  %v801_v3 = vrot.slane %v554_v10, 2 }
 0x1da   :  { %817 = vmatprep.subr.mxu0 %v1563_v16 }
 0x1dd   :  { %818 = vmatpush1.xpose.msra.mxu0 %v1571_v22 }
 0x1de   :  { %819 = vmatprep.subr.mxu0 %v1576_v18 }
 0x1e1   :  { %820 = vmatpush1.xpose.msra.mxu0 %v1586_v1 }
 0x1e2   :  { %v442_v28 = vpop.f32.mrf.mxu1  ;;  %821 = vmatprep.subr.mxu0 %v1591_v63  ;;  %v556_v63 = vld [vmem:[%s1791_s3] sm:$0x1] }
 0x1e3   :  { %v446_v57 = vadd.f32 %v442_v28, %v339_v51 }
 0x1e4   :  { %v444_v53 = vpop.f32.mrf.mxu1 }
 0x1e5   :  { %447 = vst [vmem:[#allocation2] sm:$0x1] %v446_v57  ;;  %822 = vmatpush1.xpose.msra.mxu0 %v1600_v29 }
 0x1e6   :  { %823 = vmatprep.subr.mxu0 %v1605_v30 }
 0x1e9   :  { %824 = vmatpush1.xpose.msra.mxu0 %v1614_v32 }
 0x1ea   :  { %825 = vmatprep.subr.mxu0 %v1619_v34 }
 0x1ed   :  { %826 = vmatpush1.xpose.msra.mxu0 %v1628_v36 }
 0x1ee   :  { %827 = vmatprep.subr.mxu0 %v1633_v38 }
 0x1f1   :  { %828 = vmatpush1.xpose.msra.mxu0 %v1642_v40 }
 0x1f2   :  { %829 = vmatprep.subr.mxu0 %v1647_v42 }
 0x1f5   :  { %830 = vmatpush1.xpose.msra.mxu0 %v1656_v44 }
 0x1f6   :  { %831 = vmatprep.subr.mxu0 %v1661_v46 }
 0x1f9   :  { %832 = vmatpush1.xpose.msra.mxu0 %v1670_v48 }
 0x1fa   :  { %833 = vmatprep.subr.mxu0 %v1675_v50 }
 0x1fd   :  { %834 = vmatpush1.xpose.msra.mxu0 %v1684_v52 }
 0x1fe   :  { %835 = vmatprep.subr.mxu0 %v1689_v54 }
 0x201   :  { %836 = vmatpush1.xpose.msra.mxu0 %v1698_v56 }
 0x204   :  { %870 = vmatmul.mubr.f32.vlgmr.msra.gmra.mxu0 %v801_v3 }
 0x284   :  { %v655_v18 = vpop.f32.mrf.mxu0 }
 0x285   :  { %v659_v29 = vadd.f32 %v655_v18, %v556_v63 }
 0x286   :  { %v657_v16 = vpop.f32.mrf.mxu0  ;;  %v764_v22 = vpop.f32.mrf.mxu1 }
 0x287   :  { %v768_v30 = vadd.f32 %v764_v22, %v659_v29 }
 0x288   :  { %v766_v1 = vpop.f32.mrf.mxu1 }
 0x2c4   :  { %v871_v32 = vpop.f32.mrf.mxu0 }
 0x2c5   :  { %v875_v34 = vadd.f32 %v871_v32, %v768_v30 }
 0x2c6   :  { %v873_v36 = vpop.f32.mrf.mxu0 }
 0x2c7   :  { %876 = vst [vmem:[#allocation2 + $0x1] sm:$0x1] %v875_v34 }
 0x2c8   :  { %930 = shalt.err (!%p927_p4)
}
 0x2c9   :  { %886 = dma.vmem_to_hbm [thread:$0]  %s884_s5, 32, %s1792_s4, [#allocation3]  }
 0x2ca   :  { %939 = dma.done.wait [#allocation3], 32  }
 0x2cb   :  { %940 = vsyncadd [#allocation3], 4294967264 }
 0x2cc   :  { %890 = vsyncpa [#allocation3], 1 }

</bundles_post_ra>
